<compile_context>
chip_gen: v6e
topology: v6e:2x2x1
jax: 0.10.0
libtpu: 0.0.40
codegen_flags: <defaults>
</compile_context>

<pallas_src>
import functools

import jax
import jax.numpy as jnp
from jax.experimental import pallas as pl
from jax.experimental.pallas import tpu as pltpu

_EPS = 1e-5


def _round_up(x: int, m: int) -> int:
    return ((x + m - 1) // m) * m


def _vmem_capacity_bytes() -> int:
    try:
        cap = int(pltpu.get_tpu_info().vmem_capacity_bytes)
        if cap > 0:
            return cap
    except Exception:
        pass
    return 64 * 1024 * 1024  # conservative default (v7x per-TensorCore VMEM)


def _pick_block_rows(rows_g: int, h_eff: int, itemsize: int, align: int, cap: int) -> int:
    """Row tile: big enough to amortize ~0.35us/step overhead, small enough for
    double-buffered in/out tiles + ~6 full-width f32 temps, and >= 8 grid steps
    (>= 4 per TensorCore on v7x) so the pipeline has work to prefetch against."""
    if rows_g <= align:
        return rows_g  # full-dim block (allowed even when < 8 sublanes)
    # Per-row working set: 2x-buffered input + output tiles plus ~6 f32 temps
    # (x_f32, xc, xc*xc, mean/var broadcasts, y).
    per_row = h_eff * (4 * itemsize + 6 * 4)
    budget_rows = max(align, (cap * 55 // 100) // per_row)
    # Per-step input target: large tiles on 128-MiB parts (v5e/v6e), ~1 MiB on
    # 64-MiB parts (v7x).
    target_bytes = (8 << 20) if cap >= (96 << 20) else (1 << 20)
    target_rows = max(align, target_bytes // max(1, h_eff * itemsize))
    br = min(budget_rows, target_rows, rows_g)
    # Keep >= 8 grid steps when rows permit (double-buffering + both v7x TCs).
    if rows_g >= 8 * align:
        br = min(br, pl.cdiv(rows_g, 8))
    br = max(align, (br // align) * align)
    # Near-equal blocks with an even step count (no tiny tail, no idle core).
    steps = pl.cdiv(rows_g, br)
    if steps > 1:
        steps += steps % 2
        br = max(align, _round_up(pl.cdiv(rows_g, steps), align))
    return br


def _blayernorm_kernel(x_ref, w_ref, b_ref, o_ref, *, groups, h):
    x = x_ref[...].astype(jnp.float32)          # (block_rows, groups * h)
    w = w_ref[...].astype(jnp.float32)          # (1, groups * h)
    b = b_ref[...].astype(jnp.float32)
    inv_h = 1.0 / h

    if groups == 1:
        # Plain row-wise two-pass LayerNorm (production hidden sizes >= 128).
        mu = jnp.mean(x, axis=-1, keepdims=True)
        xc = x - mu
        var = jnp.mean(xc * xc, axis=-1, keepdims=True)
        inv = jax.lax.rsqrt(var + _EPS)
        o_ref[...] = (xc * inv * w + b).astype(o_ref.dtype)
        return

    # Packed path: `groups` logical rows of width h share one lane-dense kernel
    # row of width groups*h.  Per-segment sums via an exact-f32 XOR-butterfly
    # all-reduce (log2(h) steps of pltpu.roll on the XLU + select/add on the
    # VPU); afterwards every lane of a segment holds the segment sum, so no
    # broadcast-back is needed and the MXU stays idle.
    n_lanes = groups * h
    lane = jax.lax.broadcasted_iota(jnp.int32, (1, n_lanes), 1)

    # Partner-selection masks, shape (1, n_lanes), built once per grid step and
    # shared by the mean and variance reductions.  The butterfly partner of
    # lane i at step s is lane i ^ s; we pick whichever of the two rotations
    # actually sourced that lane (checked by rolling the lane iota itself), so
    # this does not depend on the hardware rotation direction.
    shifts, masks = [], []
    s = 1
    while s < h:
        src_a = pltpu.roll(lane, shift=n_lanes - s, axis=1)  # source lane of roll A
        masks.append(src_a == jnp.bitwise_xor(lane, s))
        shifts.append(s)
        s *= 2

    def seg_allreduce(v):
        for step, m in zip(shifts, masks):
            ra = pltpu.roll(v, shift=n_lanes - step, axis=1)
            rb = pltpu.roll(v, shift=step, axis=1)
            v = v + jnp.where(m, ra, rb)
        return v

    mu = seg_allreduce(x) * inv_h                 # every lane: its segment mean
    xc = x - mu
    var = seg_allreduce(xc * xc) * inv_h          # every lane: its segment var
    inv = jax.lax.rsqrt(var + _EPS)
    o_ref[...] = (xc * inv * w + b).astype(o_ref.dtype)


@jax.jit
def blayernorm(x, weight, bias):
    """LayerNorm over the last axis, matching BLayerNorm.forward exactly."""
    orig_shape = x.shape
    h = orig_shape[-1]
    x2 = x.reshape(-1, h)
    rows = x2.shape[0]

    # Lane packing: hidden sizes narrower than the 128-lane vreg row (and
    # dividing it) get `groups` logical rows packed per kernel row so every
    # DMA / store is lane-dense.
    if h < 128 and 128 % h == 0:
        groups = 128 // h
    else:
        groups = 1
        # TODO(synk): h < 128 that does not divide 128 falls back to masked
        # (partial-lane) stores.

    h_eff = groups * h
    itemsize = jnp.dtype(x.dtype).itemsize
    align = 8 if itemsize >= 4 else (16 if itemsize == 2 else 32)

    # Rows only need to be a multiple of `groups` for the packed reshape; the
    # ragged final grid block is handled by pl.cdiv + masked stores, so no
    # sublane-alignment padding is applied.
    rows_p = _round_up(rows, groups)
    if rows_p != rows:
        # TODO(synk): handle this < `groups`-row remainder with a tiny second
        # pallas_call instead of a whole-tensor pad + final slice.
        x2 = jnp.pad(x2, ((0, rows_p - rows), (0, 0)))
    rows_g = rows_p // groups
    xg = x2.reshape(rows_g, h_eff)

    w_eff = jnp.tile(weight.reshape(-1), (groups,)).reshape(1, h_eff)
    b_eff = jnp.tile(bias.reshape(-1), (groups,)).reshape(1, h_eff)

    cap = _vmem_capacity_bytes()
    block_rows = _pick_block_rows(rows_g, h_eff, itemsize, align, cap)
    grid = (pl.cdiv(rows_g, block_rows),)

    n_elems = rows_g * h_eff
    cost = pl.CostEstimate(
        flops=10 * n_elems,
        transcendentals=rows_p,
        bytes_accessed=2 * n_elems * itemsize
        + 2 * h_eff * jnp.dtype(weight.dtype).itemsize,
    )

    kernel = functools.partial(_blayernorm_kernel, groups=groups, h=h)

    out = pl.pallas_call(
        kernel,
        out_shape=jax.ShapeDtypeStruct((rows_g, h_eff), x.dtype),
        grid_spec=pltpu.PrefetchScalarGridSpec(
            num_scalar_prefetch=0,
            grid=grid,
            in_specs=[
                pl.BlockSpec((block_rows, h_eff), lambda i: (i, 0)),
                pl.BlockSpec((1, h_eff), lambda i: (0, 0)),
                pl.BlockSpec((1, h_eff), lambda i: (0, 0)),
            ],
            out_specs=pl.BlockSpec((block_rows, h_eff), lambda i: (i, 0)),
        ),
        compiler_params=pltpu.CompilerParams(
            dimension_semantics=("parallel",),
            # ~48 MiB on v7x's 64 MiB VMEM, ~96 MiB on v5e/v6e's 128 MiB.
            vmem_limit_bytes=int(cap * 3 // 4),
        ),
        cost_estimate=cost,
    )(xg, w_eff, b_eff)

    out = out.reshape(rows_p, h)
    if rows_p != rows:
        out = out[:rows]
    return out.reshape(orig_shape)


if __name__ == "__main__":
    # Shapes implied by the module: normalize over last dim (hidden).
    batch, seq, hidden = 2, 8, 32

    key = jax.random.PRNGKey(0)
    kx, kw, kb = jax.random.split(key, 3)
    x = jax.random.normal(kx, (batch, seq, hidden), dtype=jnp.float32)

    # Deterministic params (nn.Parameter ones/zeros, deterministically
    # perturbed so the scale/shift paths are exercised).
    weight = jnp.ones((hidden,), jnp.float32) + 0.1 * jax.random.normal(kw, (hidden,))
    bias = jnp.zeros((hidden,), jnp.float32) + 0.1 * jax.random.normal(kb, (hidden,))

    y = blayernorm(x, weight, bias)
    jax.block_until_ready(y)

    # Reference check in plain JAX (same math as the PyTorch forward).
    mu = jnp.mean(x, axis=-1, keepdims=True)
    var = jnp.mean((x - mu) ** 2, axis=-1, keepdims=True)
    ref = (x - mu) / jnp.sqrt(var + 1e-5) * weight + bias
    assert jnp.allclose(y, ref, atol=1e-4, rtol=1e-4), "mismatch vs reference"

    print("KERNEL_OK")
</pallas_src>

<mosaic_0001>
module attributes {stable_mosaic.version = 11 : i64} {
  func.func @_blayernorm_kernel(%arg0: i32, %arg1: memref<4x128xf32, #tpu.memory_space<vmem>>, %arg2: memref<1x128xf32, #tpu.memory_space<vmem>>, %arg3: memref<1x128xf32, #tpu.memory_space<vmem>>, %arg4: memref<4x128xf32, #tpu.memory_space<vmem>>) attributes {dimension_semantics = [#tpu.dimension_semantics<parallel>], iteration_bounds = array<i64: 1>, scalar_prefetch = 0 : i64, scratch_operands = 0 : i64, tpu.core_type = #tpu.core_type<tc>, window_params = [{transform_indices = @transform_0, window_bounds = array<i64: 4, 128>}, {pipeline_mode = #tpu.pipeline_mode<synchronous>, transform_indices = @transform_1, window_bounds = array<i64: 1, 128>}, {pipeline_mode = #tpu.pipeline_mode<synchronous>, transform_indices = @transform_2, window_bounds = array<i64: 1, 128>}, {transform_indices = @transform_3, window_bounds = array<i64: 4, 128>}]} {
    %c0 = arith.constant 0 : index
    %c0_0 = arith.constant 0 : index
    %0 = vector.load %arg1[%c0, %c0_0] : memref<4x128xf32, #tpu.memory_space<vmem>>, vector<4x128xf32>
    %c0_1 = arith.constant 0 : index
    %c0_2 = arith.constant 0 : index
    %1 = vector.load %arg2[%c0_1, %c0_2] : memref<1x128xf32, #tpu.memory_space<vmem>>, vector<1x128xf32>
    %c0_3 = arith.constant 0 : index
    %c0_4 = arith.constant 0 : index
    %2 = vector.load %arg3[%c0_3, %c0_4] : memref<1x128xf32, #tpu.memory_space<vmem>>, vector<1x128xf32>
    %3 = tpu.iota {dimensions = array<i32: 1>} : vector<1x128xi32>
    %c127_i32 = arith.constant 127 : i32
    %4 = tpu.dynamic_rotate %3 by %c127_i32 dim 1 : vector<1x128xi32>, i32 -> vector<1x128xi32>
    %c1_i32 = arith.constant 1 : i32
    %5 = vector.broadcast %c1_i32 : i32 to vector<1x128xi32>
    %6 = arith.xori %3, %5 : vector<1x128xi32>
    %7 = arith.cmpi eq, %4, %6 : vector<1x128xi32>
    %c126_i32 = arith.constant 126 : i32
    %8 = tpu.dynamic_rotate %3 by %c126_i32 dim 1 : vector<1x128xi32>, i32 -> vector<1x128xi32>
    %c2_i32 = arith.constant 2 : i32
    %9 = vector.broadcast %c2_i32 : i32 to vector<1x128xi32>
    %10 = arith.xori %3, %9 : vector<1x128xi32>
    %11 = arith.cmpi eq, %8, %10 : vector<1x128xi32>
    %c124_i32 = arith.constant 124 : i32
    %12 = tpu.dynamic_rotate %3 by %c124_i32 dim 1 : vector<1x128xi32>, i32 -> vector<1x128xi32>
    %c4_i32 = arith.constant 4 : i32
    %13 = vector.broadcast %c4_i32 : i32 to vector<1x128xi32>
    %14 = arith.xori %3, %13 : vector<1x128xi32>
    %15 = arith.cmpi eq, %12, %14 : vector<1x128xi32>
    %c120_i32 = arith.constant 120 : i32
    %16 = tpu.dynamic_rotate %3 by %c120_i32 dim 1 : vector<1x128xi32>, i32 -> vector<1x128xi32>
    %c8_i32 = arith.constant 8 : i32
    %17 = vector.broadcast %c8_i32 : i32 to vector<1x128xi32>
    %18 = arith.xori %3, %17 : vector<1x128xi32>
    %19 = arith.cmpi eq, %16, %18 : vector<1x128xi32>
    %c112_i32 = arith.constant 112 : i32
    %20 = tpu.dynamic_rotate %3 by %c112_i32 dim 1 : vector<1x128xi32>, i32 -> vector<1x128xi32>
    %c16_i32 = arith.constant 16 : i32
    %21 = vector.broadcast %c16_i32 : i32 to vector<1x128xi32>
    %22 = arith.xori %3, %21 : vector<1x128xi32>
    %23 = arith.cmpi eq, %20, %22 : vector<1x128xi32>
    %c127_i32_5 = arith.constant 127 : i32
    %24 = tpu.dynamic_rotate %0 by %c127_i32_5 dim 1 : vector<4x128xf32>, i32 -> vector<4x128xf32>
    %c1_i32_6 = arith.constant 1 : i32
    %25 = tpu.dynamic_rotate %0 by %c1_i32_6 dim 1 : vector<4x128xf32>, i32 -> vector<4x128xf32>
    %26 = vector.shape_cast %7 : vector<1x128xi1> to vector<1x128xi1>
    %27 = vector.broadcast %26 : vector<1x128xi1> to vector<4x128xi1>
    %28 = arith.select %27, %24, %25 : vector<4x128xi1>, vector<4x128xf32>
    %29 = arith.addf %0, %28 : vector<4x128xf32>
    %c126_i32_7 = arith.constant 126 : i32
    %30 = tpu.dynamic_rotate %29 by %c126_i32_7 dim 1 : vector<4x128xf32>, i32 -> vector<4x128xf32>
    %c2_i32_8 = arith.constant 2 : i32
    %31 = tpu.dynamic_rotate %29 by %c2_i32_8 dim 1 : vector<4x128xf32>, i32 -> vector<4x128xf32>
    %32 = vector.shape_cast %11 : vector<1x128xi1> to vector<1x128xi1>
    %33 = vector.broadcast %32 : vector<1x128xi1> to vector<4x128xi1>
    %34 = arith.select %33, %30, %31 : vector<4x128xi1>, vector<4x128xf32>
    %35 = arith.addf %29, %34 : vector<4x128xf32>
    %c124_i32_9 = arith.constant 124 : i32
    %36 = tpu.dynamic_rotate %35 by %c124_i32_9 dim 1 : vector<4x128xf32>, i32 -> vector<4x128xf32>
    %c4_i32_10 = arith.constant 4 : i32
    %37 = tpu.dynamic_rotate %35 by %c4_i32_10 dim 1 : vector<4x128xf32>, i32 -> vector<4x128xf32>
    %38 = vector.shape_cast %15 : vector<1x128xi1> to vector<1x128xi1>
    %39 = vector.broadcast %38 : vector<1x128xi1> to vector<4x128xi1>
    %40 = arith.select %39, %36, %37 : vector<4x128xi1>, vector<4x128xf32>
    %41 = arith.addf %35, %40 : vector<4x128xf32>
    %c120_i32_11 = arith.constant 120 : i32
    %42 = tpu.dynamic_rotate %41 by %c120_i32_11 dim 1 : vector<4x128xf32>, i32 -> vector<4x128xf32>
    %c8_i32_12 = arith.constant 8 : i32
    %43 = tpu.dynamic_rotate %41 by %c8_i32_12 dim 1 : vector<4x128xf32>, i32 -> vector<4x128xf32>
    %44 = vector.shape_cast %19 : vector<1x128xi1> to vector<1x128xi1>
    %45 = vector.broadcast %44 : vector<1x128xi1> to vector<4x128xi1>
    %46 = arith.select %45, %42, %43 : vector<4x128xi1>, vector<4x128xf32>
    %47 = arith.addf %41, %46 : vector<4x128xf32>
    %c112_i32_13 = arith.constant 112 : i32
    %48 = tpu.dynamic_rotate %47 by %c112_i32_13 dim 1 : vector<4x128xf32>, i32 -> vector<4x128xf32>
    %c16_i32_14 = arith.constant 16 : i32
    %49 = tpu.dynamic_rotate %47 by %c16_i32_14 dim 1 : vector<4x128xf32>, i32 -> vector<4x128xf32>
    %50 = vector.shape_cast %23 : vector<1x128xi1> to vector<1x128xi1>
    %51 = vector.broadcast %50 : vector<1x128xi1> to vector<4x128xi1>
    %52 = arith.select %51, %48, %49 : vector<4x128xi1>, vector<4x128xf32>
    %53 = arith.addf %47, %52 : vector<4x128xf32>
    %cst = arith.constant 3.125000e-02 : f32
    %54 = vector.broadcast %cst : f32 to vector<4x128xf32>
    %55 = arith.mulf %53, %54 : vector<4x128xf32>
    %56 = arith.subf %0, %55 : vector<4x128xf32>
    %57 = arith.mulf %56, %56 : vector<4x128xf32>
    %c127_i32_15 = arith.constant 127 : i32
    %58 = tpu.dynamic_rotate %57 by %c127_i32_15 dim 1 : vector<4x128xf32>, i32 -> vector<4x128xf32>
    %c1_i32_16 = arith.constant 1 : i32
    %59 = tpu.dynamic_rotate %57 by %c1_i32_16 dim 1 : vector<4x128xf32>, i32 -> vector<4x128xf32>
    %60 = vector.shape_cast %7 : vector<1x128xi1> to vector<1x128xi1>
    %61 = vector.broadcast %60 : vector<1x128xi1> to vector<4x128xi1>
    %62 = arith.select %61, %58, %59 : vector<4x128xi1>, vector<4x128xf32>
    %63 = arith.addf %57, %62 : vector<4x128xf32>
    %c126_i32_17 = arith.constant 126 : i32
    %64 = tpu.dynamic_rotate %63 by %c126_i32_17 dim 1 : vector<4x128xf32>, i32 -> vector<4x128xf32>
    %c2_i32_18 = arith.constant 2 : i32
    %65 = tpu.dynamic_rotate %63 by %c2_i32_18 dim 1 : vector<4x128xf32>, i32 -> vector<4x128xf32>
    %66 = vector.shape_cast %11 : vector<1x128xi1> to vector<1x128xi1>
    %67 = vector.broadcast %66 : vector<1x128xi1> to vector<4x128xi1>
    %68 = arith.select %67, %64, %65 : vector<4x128xi1>, vector<4x128xf32>
    %69 = arith.addf %63, %68 : vector<4x128xf32>
    %c124_i32_19 = arith.constant 124 : i32
    %70 = tpu.dynamic_rotate %69 by %c124_i32_19 dim 1 : vector<4x128xf32>, i32 -> vector<4x128xf32>
    %c4_i32_20 = arith.constant 4 : i32
    %71 = tpu.dynamic_rotate %69 by %c4_i32_20 dim 1 : vector<4x128xf32>, i32 -> vector<4x128xf32>
    %72 = vector.shape_cast %15 : vector<1x128xi1> to vector<1x128xi1>
    %73 = vector.broadcast %72 : vector<1x128xi1> to vector<4x128xi1>
    %74 = arith.select %73, %70, %71 : vector<4x128xi1>, vector<4x128xf32>
    %75 = arith.addf %69, %74 : vector<4x128xf32>
    %c120_i32_21 = arith.constant 120 : i32
    %76 = tpu.dynamic_rotate %75 by %c120_i32_21 dim 1 : vector<4x128xf32>, i32 -> vector<4x128xf32>
    %c8_i32_22 = arith.constant 8 : i32
    %77 = tpu.dynamic_rotate %75 by %c8_i32_22 dim 1 : vector<4x128xf32>, i32 -> vector<4x128xf32>
    %78 = vector.shape_cast %19 : vector<1x128xi1> to vector<1x128xi1>
    %79 = vector.broadcast %78 : vector<1x128xi1> to vector<4x128xi1>
    %80 = arith.select %79, %76, %77 : vector<4x128xi1>, vector<4x128xf32>
    %81 = arith.addf %75, %80 : vector<4x128xf32>
    %c112_i32_23 = arith.constant 112 : i32
    %82 = tpu.dynamic_rotate %81 by %c112_i32_23 dim 1 : vector<4x128xf32>, i32 -> vector<4x128xf32>
    %c16_i32_24 = arith.constant 16 : i32
    %83 = tpu.dynamic_rotate %81 by %c16_i32_24 dim 1 : vector<4x128xf32>, i32 -> vector<4x128xf32>
    %84 = vector.shape_cast %23 : vector<1x128xi1> to vector<1x128xi1>
    %85 = vector.broadcast %84 : vector<1x128xi1> to vector<4x128xi1>
    %86 = arith.select %85, %82, %83 : vector<4x128xi1>, vector<4x128xf32>
    %87 = arith.addf %81, %86 : vector<4x128xf32>
    %cst_25 = arith.constant 3.125000e-02 : f32
    %88 = vector.broadcast %cst_25 : f32 to vector<4x128xf32>
    %89 = arith.mulf %87, %88 : vector<4x128xf32>
    %cst_26 = arith.constant 9.99999974E-6 : f32
    %90 = vector.broadcast %cst_26 : f32 to vector<4x128xf32>
    %91 = arith.addf %89, %90 : vector<4x128xf32>
    %92 = math.rsqrt %91 : vector<4x128xf32>
    %93 = arith.mulf %56, %92 : vector<4x128xf32>
    %94 = vector.broadcast %1 : vector<1x128xf32> to vector<4x128xf32>
    %95 = arith.mulf %93, %94 : vector<4x128xf32>
    %96 = vector.broadcast %2 : vector<1x128xf32> to vector<4x128xf32>
    %97 = arith.addf %95, %96 : vector<4x128xf32>
    %c0_27 = arith.constant 0 : index
    %c0_28 = arith.constant 0 : index
    %98 = vector.load %arg4[%c0_27, %c0_28] : memref<4x128xf32, #tpu.memory_space<vmem>>, vector<4x128xf32>
    tpu.vector_store %arg4[%c0_27, %c0_28], %97 {strides = array<i32>} : memref<4x128xf32, #tpu.memory_space<vmem>>, vector<4x128xf32>,
    return
  }
  func.func @transform_0(%arg0: i32) -> (i32, i32) {
    %c0_i32 = arith.constant 0 : i32
    %c0_i32_0 = arith.constant 0 : i32
    return %arg0, %c0_i32 : i32, i32
  }
  func.func @transform_1(%arg0: i32) -> (i32, i32) {
    %c0_i32 = arith.constant 0 : i32
    %c0_i32_0 = arith.constant 0 : i32
    %c0_i32_1 = arith.constant 0 : i32
    return %c0_i32, %c0_i32_0 : i32, i32
  }
  func.func @transform_2(%arg0: i32) -> (i32, i32) {
    %c0_i32 = arith.constant 0 : i32
    %c0_i32_0 = arith.constant 0 : i32
    %c0_i32_1 = arith.constant 0 : i32
    return %c0_i32, %c0_i32_0 : i32, i32
  }
  func.func @transform_3(%arg0: i32) -> (i32, i32) {
    %c0_i32 = arith.constant 0 : i32
    %c0_i32_0 = arith.constant 0 : i32
    return %arg0, %c0_i32 : i32, i32
  }
}

</mosaic_0001>

<bundles_post_ra>
// kernel: tile.14
= control target key start
LH: loop header
LB: loop body
LE: loop exit
PB: predicated region body
PF: predicated region fallthrough
CT: control target
= control target key end

     0   :  { %vm8_vm0 = vcmask 261120   ;;  %s40_s8 = smov 32   ;;  %s41_s9 = smov 64   ;;  %vm14_vm1 = vcmask 1048320   ;;  %vm20_vm2 = vcmask 785920   ;;  %vm26_vm3 = vcmask 523520   ;;  %s58_s0 = inlined_call_operand.vmem [shape: f32[4,32], index: 0, kind: input, shape index: {}]   ;;  %s59_s1 = inlined_call_operand.vmem [shape: f32[1,128], index: 1, kind: output, shape index: {}]  }
   0x1   :  { %v5_v0 = vld [vmem:[%s58_s0] sm:$0xf]  ;;  %s39_s0 = smov 96  }
   0x2   :  { %6 = vst [vmem:[#allocation1] sm:$0xf] %v5_v0 }
   0x9   :  { %v11_v1 = vld [vmem:[#allocation1 + $0x3] sm:$0x1]   ;;  %v23_v2 = vld [vmem:[#allocation1 + $0x1] sm:$0x1]   ;;  %v7_v3 = vld [vmem:[#allocation1] sm:$0x1]  }
   0xa   :  { %12 = vrot.lane.b32.xlu0 %v11_v1, %s39_s0  ;;  %24 = vrot.lane.b32.xlu1 %v23_v2, %s40_s8  ;;  %v17_v4 = vld [vmem:[#allocation1 + $0x2] sm:$0x1]   ;;  %9 = vst.msk [vmem:[#allocation0] sm:$0x1] %vm8_vm0, %v7_v3  }
   0xe   :  { %18 = vrot.lane.b32.xlu0 %v17_v4, %s41_s9 }
  0x7c   :  { %v13_v5 = vpop.permute.xlu0 %12   ;;  %v25_v6 = vpop.permute.xlu1 %24  }
  0x7d   :  { %15 = vst.msk [vmem:[#allocation0] sm:$0x1] %vm14_vm1, %v13_v5  }
  0x80   :  { %v19_v7 = vpop.permute.xlu0 %18  }
  0x81   :  { %21 = vst.msk [vmem:[#allocation0] sm:$0x1] %vm20_vm2, %v19_v7  }
  0x82   :  { %27 = vst.msk [vmem:[#allocation0] sm:$0x1] %vm26_vm3, %v25_v6  }
  0x89   :  { %v32_v8 = vld [vmem:[#allocation0] sm:$0x1] }
  0x8a   :  { %35 = vst [vmem:[%s59_s1] sm:$0x1] %v32_v8 }

// kernel: tile.13
= control target key start
LH: loop header
LB: loop body
LE: loop exit
PB: predicated region body
PF: predicated region fallthrough
CT: control target
= control target key end

     0   :  { %s22_s0 = inlined_call_operand.vmem [shape: f32[32], index: 0, kind: input, shape index: {}]   ;;  %s23_s1 = inlined_call_operand.vmem [shape: f32[4,32], index: 1, kind: output, shape index: {}]  }
   0x1   :  { %v4_v0 = vld [vmem:[%s22_s0] ss:$0 sm:$0xff] }
   0x2   :  { %5 = vst [vmem:[%s23_s1] sm:$0xf] %v4_v0 }

// kernel: blayernorm.1
= control target key start
LH: loop header
LB: loop body
LE: loop exit
PB: predicated region body
PF: predicated region fallthrough
CT: control target
= control target key end

     0   :  { %v17_v0 = vlaneseq  ;;  %s170_s14 = smov 1   ;;  %s171_s15 = smov 127   ;;  %v173_v7 = vmov 0   ;;  %s303_s0 = inlined_call_operand.vmem [shape: f32[4,128], index: 0, kind: input, shape index: {}]   ;;  %s304_s1 = inlined_call_operand.vmem [shape: f32[1,128], index: 1, kind: input, shape index: {}]   ;;  %s305_s2 = inlined_call_operand.vmem [shape: f32[1,128], index: 2, kind: input, shape index: {}]   ;;  %s306_s3 = inlined_call_operand.vmem [shape: f32[4,128], index: 3, kind: output, shape index: {}]  }
   0x1   :  { %v204_v1 = vld [vmem:[%s303_s0] sm:$0xf]  ;;  %s172_s16 = smov 126   ;;  %s174_s0 = smov 2  }
   0x2   :  { %v206_v2 = vand.u32 127, %v17_v0  ;;  %41 = vrot.lane.b32.xlu1 %v204_v1, %s170_s14  ;;  %v45_v3 = vshrl.u32 %v17_v0, 7  ;;  %s175_s17 = smov 124   ;;  %s176_s18 = smov 4  }
   0x3   :  { %s177_s19 = smov 120   ;;  %s178_s20 = smov 8  }
   0x4   :  { %19 = vrot.lane.b32.xlu0 %v206_v2, %s171_s15  ;;  %v21_v4 = vxor.u32 1, %v206_v2  ;;  %v217_v5 = vsub.s32 0, %v45_v3  ;;  %v25_v15 = vxor.u32 2, %v206_v2  ;;  %v29_v24 = vxor.u32 4, %v206_v2  ;;  %s179_s21 = smov 112   ;;  %s180_s22 = smov 16  }
   0x5   :  { %v33_v33 = vxor.u32 8, %v206_v2  ;;  %v37_v42 = vxor.u32 16, %v206_v2 }
   0x6   :  { %23 = vrot.lane.b32.xlu1 %v206_v2, %s172_s16 }
   0x8   :  { %39 = vrot.lane.b32.xlu0 %v204_v1, %s171_s15 }
  0x74   :  { %v42_v10 = vpop.permute.xlu1 %41 }
  0x76   :  { %v20_v6 = vpop.permute.xlu0 %19 }
  0x77   :  { %vm22_vm0 = vcmp.eq.s32.totalorder %v20_v6, %v21_v4 }
  0x78   :  { %v43_v8 = vsel %vm22_vm0, 1, %v173_v7  ;;  %v24_v16 = vpop.permute.xlu1 %23 }
  0x79   :  { %v47_v9 = vrot.slane %v43_v8, %v217_v5  ;;  %vm26_vm2 = vcmp.eq.s32.totalorder %v24_v16, %v25_v15  ;;  %v156_v15 = vld [vmem:[%s305_s2] ss:$0 sm:$0xff] }
  0x7a   :  { %v40_v11 = vpop.permute.xlu0 %39  ;;  %v55_v17 = vsel %vm26_vm2, 1, %v173_v7 }
  0x7b   :  { %vm220_vm1 = vcmp.eq.s32.totalorder %v47_v9, 1  ;;  %v59_v18 = vrot.slane %v55_v17, %v217_v5 }
  0x7c   :  { %v49_v13 = vsel %vm220_vm1, %v40_v11, %v42_v10 }
  0x7d   :  { %v50_v14 = vadd.f32 %v49_v13, %v204_v1  ;;  %vm233_vm3 = vcmp.eq.s32.totalorder %v59_v18, 1  ;;  %v155_v13 = vld [vmem:[%s304_s1] ss:$0 sm:$0xff] }
  0x7f   :  { %53 = vrot.lane.b32.xlu1 %v50_v14, %s174_s0  ;;  %51 = vrot.lane.b32.xlu0 %v50_v14, %s172_s16 }
  0x83   :  { %27 = vrot.lane.b32.xlu0 %v206_v2, %s175_s17 }
  0xf1   :  { %v54_v20 = vpop.permute.xlu1 %53  ;;  %v52_v21 = vpop.permute.xlu0 %51 }
  0xf2   :  { %v61_v22 = vsel %vm233_vm3, %v52_v21, %v54_v20 }
  0xf3   :  { %v62_v23 = vadd.f32 %v61_v22, %v50_v14 }
  0xf5   :  { %65 = vrot.lane.b32.xlu0 %v62_v23, %s176_s18  ;;  %63 = vrot.lane.b32.xlu1 %v62_v23, %s175_s17  ;;  %v28_v25 = vpop.permute.xlu0 %27 }
  0xf6   :  { %vm30_vm4 = vcmp.eq.s32.totalorder %v28_v25, %v29_v24 }
  0xf7   :  { %v67_v26 = vsel %vm30_vm4, 1, %v173_v7 }
  0xf8   :  { %v71_v27 = vrot.slane %v67_v26, %v217_v5 }
  0xf9   :  { %31 = vrot.lane.b32.xlu1 %v206_v2, %s177_s19 }
  0xfa   :  { %vm245_vm5 = vcmp.eq.s32.totalorder %v71_v27, 1 }
 0x167   :  { %v64_v29 = vpop.permute.xlu1 %63  ;;  %v66_v30 = vpop.permute.xlu0 %65 }
 0x168   :  { %v73_v31 = vsel %vm245_vm5, %v64_v29, %v66_v30 }
 0x169   :  { %v74_v32 = vadd.f32 %v73_v31, %v62_v23 }
 0x16b   :  { %77 = vrot.lane.b32.xlu1 %v74_v32, %s178_s20  ;;  %75 = vrot.lane.b32.xlu0 %v74_v32, %s177_s19  ;;  %v32_v34 = vpop.permute.xlu1 %31 }
 0x16c   :  { %vm34_vm6 = vcmp.eq.s32.totalorder %v32_v34, %v33_v33 }
 0x16d   :  { %v79_v35 = vsel %vm34_vm6, 1, %v173_v7 }
 0x16e   :  { %v83_v36 = vrot.slane %v79_v35, %v217_v5 }
 0x16f   :  { %35 = vrot.lane.b32.xlu0 %v206_v2, %s179_s21 }
 0x170   :  { %vm257_vm7 = vcmp.eq.s32.totalorder %v83_v36, 1 }
 0x1dd   :  { %v78_v38 = vpop.permute.xlu1 %77  ;;  %v76_v39 = vpop.permute.xlu0 %75 }
 0x1de   :  { %v85_v40 = vsel %vm257_vm7, %v76_v39, %v78_v38 }
 0x1df   :  { %v86_v41 = vadd.f32 %v85_v40, %v74_v32 }
 0x1e1   :  { %89 = vrot.lane.b32.xlu0 %v86_v41, %s180_s22  ;;  %87 = vrot.lane.b32.xlu1 %v86_v41, %s179_s21  ;;  %v36_v43 = vpop.permute.xlu0 %35 }
 0x1e2   :  { %vm38_vm8 = vcmp.eq.s32.totalorder %v36_v43, %v37_v42 }
 0x1e3   :  { %v91_v44 = vsel %vm38_vm8, 1, %v173_v7 }
 0x1e4   :  { %v95_v45 = vrot.slane %v91_v44, %v217_v5 }
 0x1e6   :  { %vm267_vm9 = vcmp.eq.s32.totalorder %v95_v45, 1 }
 0x253   :  { %v88_v47 = vpop.permute.xlu1 %87  ;;  %v90_v48 = vpop.permute.xlu0 %89 }
 0x254   :  { %v97_v49 = vsel %vm267_vm9, %v88_v47, %v90_v48 }
 0x255   :  { %v98_v50 = vadd.f32 %v97_v49, %v86_v41 }
 0x257   :  { %v99_v51 = vmul.f32 0.03125, %v98_v50 }
 0x259   :  { %v100_v52 = vsub.f32 %v204_v1, %v99_v51 }
 0x25b   :  { %v101_v53 = vmul.f32 %v100_v52, %v100_v52 }
 0x25d   :  { %104 = vrot.lane.b32.xlu0 %v101_v53, %s170_s14  ;;  %102 = vrot.lane.b32.xlu1 %v101_v53, %s171_s15 }
 0x2cf   :  { %v105_v54 = vpop.permute.xlu0 %104  ;;  %v103_v55 = vpop.permute.xlu1 %102 }
 0x2d0   :  { %v106_v56 = vsel %vm220_vm1, %v103_v55, %v105_v54 }
 0x2d1   :  { %v107_v57 = vadd.f32 %v106_v56, %v101_v53 }
 0x2d3   :  { %110 = vrot.lane.b32.xlu0 %v107_v57, %s174_s0  ;;  %108 = vrot.lane.b32.xlu1 %v107_v57, %s172_s16 }
 0x345   :  { %v111_v58 = vpop.permute.xlu0 %110  ;;  %v109_v59 = vpop.permute.xlu1 %108 }
 0x346   :  { %v112_v60 = vsel %vm233_vm3, %v109_v59, %v111_v58 }
 0x347   :  { %v113_v61 = vadd.f32 %v112_v60, %v107_v57 }
 0x349   :  { %116 = vrot.lane.b32.xlu0 %v113_v61, %s176_s18  ;;  %114 = vrot.lane.b32.xlu1 %v113_v61, %s175_s17 }
 0x3bb   :  { %v117_v62 = vpop.permute.xlu0 %116  ;;  %v115_v63 = vpop.permute.xlu1 %114 }
 0x3bc   :  { %v118_v0 = vsel %vm245_vm5, %v115_v63, %v117_v62 }
 0x3bd   :  { %v119_v1 = vadd.f32 %v118_v0, %v113_v61 }
 0x3bf   :  { %122 = vrot.lane.b32.xlu0 %v119_v1, %s178_s20  ;;  %120 = vrot.lane.b32.xlu1 %v119_v1, %s177_s19 }
 0x431   :  { %v123_v2 = vpop.permute.xlu0 %122  ;;  %v121_v3 = vpop.permute.xlu1 %120 }
 0x432   :  { %v124_v4 = vsel %vm257_vm7, %v121_v3, %v123_v2 }
 0x433   :  { %v125_v5 = vadd.f32 %v124_v4, %v119_v1 }
 0x435   :  { %128 = vrot.lane.b32.xlu0 %v125_v5, %s180_s22  ;;  %126 = vrot.lane.b32.xlu1 %v125_v5, %s179_s21 }
 0x4a7   :  { %v129_v6 = vpop.permute.xlu0 %128  ;;  %v127_v7 = vpop.permute.xlu1 %126 }
 0x4a8   :  { %v130_v8 = vsel %vm267_vm9, %v127_v7, %v129_v6 }
 0x4a9   :  { %v131_v9 = vadd.f32 %v130_v8, %v125_v5 }
 0x4ab   :  { %v132_v10 = vmul.f32 0.03125, %v131_v9 }
 0x4ad   :  { %v133_v11 = vadd.f32 1e-05, %v132_v10 }
 0x4af   :  { %168 = vrsqrt.f32 %v133_v11 }
 0x4bc   :  { %v169_v12 = vpop.eup %168 }
 0x4bd   :  { %v135_v14 = vmul.f32 %v169_v12, %v100_v52 }
 0x4bf   :  { %v142_v16 = vmul.f32 %v155_v13, %v135_v14 }
 0x4c1   :  { %v149_v17 = vadd.f32 %v156_v15, %v142_v16 }
 0x4c3   :  { %150 = vst [vmem:[%s306_s3] sm:$0xf] %v149_v17 }

</bundles_post_ra>
